<compile_context>
chip_gen: v6e
topology: v6e:2x2x1
jax: 0.10.0
libtpu: 0.0.40
codegen_flags: <defaults>
</compile_context>

<pallas_src>
import jax
import jax.numpy as jnp
from jax import lax
from jax.experimental import pallas as pl
from jax.experimental.pallas import tpu as pltpu


def _round_up(n, m):
    return ((n + m - 1) // m) * m


def _icarl_kernel(x_ref, means_ref, bias_ref, out_ref):
    # x_ref:     [TB, F]  batch tile of raw (un-normalized) features (f32 or bf16)
    # means_ref: [F, Cp]  resident class means, pre-scaled by -2 (same dtype as x)
    # bias_ref:  [1, Cp]  precomputed 1 + ||m_c||^2 (f32, from the rounded means)
    # out_ref:   [TB, Cp] negative Euclidean distances
    x32 = x_ref[...].astype(jnp.float32)                      # VPU, f32 accumulation
    sumsq = jnp.sum(x32 * x32, axis=1, keepdims=True)         # [TB, 1]
    inv = lax.rsqrt(jnp.maximum(sumsq, 1e-30))                 # EUP; clamp only guards
                                                               # all-zero (padded) rows
    # Cross term on the MXU with f32 accumulation; normalization applied afterwards:
    # (x @ (-2*m)) * (1/||x||)  ==  -2 * xn . m
    cross = jnp.dot(x_ref[...], means_ref[...],
                    preferred_element_type=jnp.float32)        # [TB, Cp]

    d2 = jnp.maximum(bias_ref[...] + cross * inv, 0.0)         # ||xn - m||^2
    out_ref[...] = (-jnp.sqrt(d2)).astype(out_ref.dtype)       # == (-cdist).T tile


def icarl_forward(x, class_means, *, block_b=1024,
                  matmul_dtype=jnp.bfloat16, out_dtype=jnp.float32):
    """x: [B, F], class_means: [F, C] -> [B, C] negative Euclidean distances."""
    B, F = x.shape
    F2, C = class_means.shape
    assert F == F2, "feature dims must match"

    matmul_dtype = jnp.dtype(matmul_dtype)
    out_dtype = jnp.dtype(out_dtype)
    op_bytes = matmul_dtype.itemsize
    ob_bytes = out_dtype.itemsize
    sublane = 16 if op_bytes == 2 else 8

    # Lane-dense class dimension (padded zero columns are sliced off the output).
    Cp = _round_up(C, 128)

    # Round the means ONCE to the matmul dtype; derive the bias term from the same
    # rounded values (keeps 1 + ||m||^2 consistent with the cross term) and fold the
    # -2 into the resident operand (exact power-of-two scaling).
    means_r = class_means.astype(jnp.float32).astype(matmul_dtype)
    means_f32 = means_r.astype(jnp.float32)
    bias = 1.0 + jnp.sum(means_f32 * means_f32, axis=0, keepdims=True)   # [1, C] f32
    means_scaled = (means_f32 * (-2.0)).astype(matmul_dtype)             # [F, C]
    if Cp != C:
        means_scaled = jnp.pad(means_scaled, ((0, 0), (0, Cp - C)))
        bias = jnp.pad(bias, ((0, 0), (0, Cp - C)))

    # Stream x in the matmul dtype (halves the dominant HBM read on the bf16 path).
    x = x.astype(matmul_dtype)

    # Generation-aware VMEM budget (v7x: 64 MiB/core; v5e/v6e: 128 MiB).
    try:
        vmem_cap = int(pltpu.get_tpu_info().vmem_capacity_bytes)
    except Exception:  # conservative fallback (v7x-safe)
        vmem_cap = 64 * 1024 * 1024
    resident = F * Cp * op_bytes + 8 * Cp * 4          # single-buffered means + bias
    budget = int(vmem_cap * 0.9) - (4 << 20)

    # Balanced batch tiles: minimize last-tile padding and keep the double-buffered
    # x / out streams plus the resident means under the VMEM budget.
    num_tiles = max(1, pl.cdiv(B, block_b))
    while True:
        TB = _round_up(pl.cdiv(B, num_tiles), sublane)
        streams = 2 * TB * (F * op_bytes + Cp * ob_bytes)
        if resident + streams <= budget or TB <= sublane:
            break
        num_tiles += 1
    num_tiles = pl.cdiv(B, TB)
    Bp = num_tiles * TB
    if Bp != B:
        # Balanced tiles keep this to < `sublane` rows per tile.
        x = jnp.pad(x, ((0, Bp - B), (0, 0)))

    needed = resident + 2 * TB * (F * op_bytes + Cp * ob_bytes)
    vmem_limit = int(min(max(needed + (4 << 20), 16 << 20), vmem_cap - (2 << 20)))

    cost = pl.CostEstimate(
        flops=2 * Bp * F * Cp + 6 * Bp * Cp + 2 * Bp * F,
        transcendentals=Bp * (Cp + 1),
        bytes_accessed=Bp * F * op_bytes + F * Cp * op_bytes + Cp * 4
                       + Bp * Cp * ob_bytes,
    )

    out = pl.pallas_call(
        _icarl_kernel,
        out_shape=jax.ShapeDtypeStruct((Bp, Cp), out_dtype),
        grid_spec=pltpu.PrefetchScalarGridSpec(
            num_scalar_prefetch=0,
            grid=(num_tiles,),
            in_specs=[
                pl.BlockSpec((TB, F), lambda i: (i, 0)),           # streamed batch tile
                pl.BlockSpec(memory_space=pltpu.MemorySpace.VMEM),  # resident -2*means
                pl.BlockSpec(memory_space=pltpu.MemorySpace.VMEM),  # resident 1+||m||^2
            ],
            out_specs=pl.BlockSpec((TB, Cp), lambda i: (i, 0)),
        ),
        compiler_params=pltpu.CompilerParams(
            dimension_semantics=("parallel",),
            vmem_limit_bytes=vmem_limit,
        ),
        cost_estimate=cost,
    )(x, means_scaled, bias)

    if Bp != B or Cp != C:
        out = out[:B, :C]
    return out


def icarl_forward_ref(x, class_means):
    """Pure-JAX reference for correctness checking (f32)."""
    xn = x / jnp.linalg.norm(x, axis=1, keepdims=True)
    diff = class_means.T[:, None, :] - xn[None, :, :]          # [C, B, F]
    sqd = jnp.sqrt(jnp.sum(diff * diff, axis=-1))               # [C, B]
    return -sqd.T                                               # [B, C]


if __name__ == "__main__":
    key = jax.random.PRNGKey(0)

    # Case 1: small shapes matching the module (batch=8, embedding=32, classes=16).
    B, F, C = 8, 32, 16
    kx, km, kx2, km2 = jax.random.split(key, 4)
    x = jax.random.normal(kx, (B, F), dtype=jnp.float32)
    raw_means = jax.random.normal(km, (F, C), dtype=jnp.float32)
    class_means = raw_means / jnp.linalg.norm(raw_means, axis=0, keepdims=True)

    ref = icarl_forward_ref(x, class_means)

    # f32 matmul operands.
    out_f32 = jax.block_until_ready(
        icarl_forward(x, class_means, matmul_dtype=jnp.float32))
    assert out_f32.shape == (B, C)
    assert jnp.allclose(out_f32, ref, atol=2e-2, rtol=2e-2), "f32 mismatch vs reference"

    # bf16 streaming path (default perf path): looser tolerance.
    out_bf16 = jax.block_until_ready(
        icarl_forward(x, class_means, matmul_dtype=jnp.bfloat16))
    assert out_bf16.shape == (B, C)
    assert jnp.allclose(out_bf16, ref, atol=5e-2, rtol=5e-2), "bf16 mismatch vs reference"

    # Case 2: exercise the batch grid + B/C padding paths (3 batch tiles, bf16).
    B2, F2, C2 = 40, 32, 10
    x2 = jax.random.normal(kx2, (B2, F2), dtype=jnp.float32)
    raw_means2 = jax.random.normal(km2, (F2, C2), dtype=jnp.float32)
    class_means2 = raw_means2 / jnp.linalg.norm(raw_means2, axis=0, keepdims=True)

    ref2 = icarl_forward_ref(x2, class_means2)
    out2 = jax.block_until_ready(
        icarl_forward(x2, class_means2, block_b=16, matmul_dtype=jnp.float32))
    assert out2.shape == (B2, C2)
    assert jnp.allclose(out2, ref2, atol=2e-2, rtol=2e-2), "tiled mismatch vs reference"

    out2b = jax.block_until_ready(
        icarl_forward(x2, class_means2, block_b=16, matmul_dtype=jnp.bfloat16))
    assert jnp.allclose(out2b, ref2, atol=5e-2, rtol=5e-2), "tiled bf16 mismatch vs reference"

    print("KERNEL_OK")
</pallas_src>

<mosaic_0001>
module attributes {stable_mosaic.version = 11 : i64} {
  func.func @_icarl_kernel(%arg0: i32, %arg1: memref<8x32xf32, #tpu.memory_space<vmem>>, %arg2: memref<32x128xf32, #tpu.memory_space<vmem>>, %arg3: memref<1x128xf32, #tpu.memory_space<vmem>>, %arg4: memref<8x128xf32, #tpu.memory_space<vmem>>) attributes {dimension_semantics = [#tpu.dimension_semantics<parallel>], iteration_bounds = array<i64: 1>, scalar_prefetch = 0 : i64, scratch_operands = 0 : i64, tpu.core_type = #tpu.core_type<tc>, window_params = [{transform_indices = @transform_0, window_bounds = array<i64: 8, 32>}, {pipeline_mode = #tpu.pipeline_mode<synchronous>, transform_indices = @transform_1, window_bounds = array<i64: 32, 128>}, {pipeline_mode = #tpu.pipeline_mode<synchronous>, transform_indices = @transform_2, window_bounds = array<i64: 1, 128>}, {transform_indices = @transform_3, window_bounds = array<i64: 8, 128>}]} {
    %c0 = arith.constant 0 : index
    %c0_0 = arith.constant 0 : index
    %0 = vector.load %arg1[%c0, %c0_0] : memref<8x32xf32, #tpu.memory_space<vmem>>, vector<8x32xf32>
    %1 = arith.mulf %0, %0 : vector<8x32xf32>
    %cst = arith.constant dense<0.000000e+00> : vector<8xf32>
    %2 = vector.multi_reduction <add>, %1, %cst [1] : vector<8x32xf32> to vector<8xf32>
    %3 = vector.shape_cast %2 : vector<8xf32> to vector<8x1xf32>
    %cst_1 = arith.constant 1.000000e-30 : f32
    %4 = vector.broadcast %cst_1 : f32 to vector<8x1xf32>
    %5 = arith.maximumf %3, %4 : vector<8x1xf32>
    %6 = math.rsqrt %5 : vector<8x1xf32>
    %c0_2 = arith.constant 0 : index
    %c0_3 = arith.constant 0 : index
    %7 = vector.load %arg1[%c0_2, %c0_3] : memref<8x32xf32, #tpu.memory_space<vmem>>, vector<8x32xf32>
    %c0_4 = arith.constant 0 : index
    %c0_5 = arith.constant 0 : index
    %8 = vector.load %arg2[%c0_4, %c0_5] : memref<32x128xf32, #tpu.memory_space<vmem>>, vector<32x128xf32>
    %cst_6 = arith.constant dense<0.000000e+00> : vector<8x128xf32>
    %9 = tpu.matmul %7, %8, %cst_6 {dimension_numbers = #tpu.dot_dimension_numbers<[1], [0], [0], [1], [0, 0, 1, 1], [], []>} : vector<8x32xf32>, vector<32x128xf32>, vector<8x128xf32> -> vector<8x128xf32>
    %c0_7 = arith.constant 0 : index
    %c0_8 = arith.constant 0 : index
    %10 = vector.load %arg3[%c0_7, %c0_8] : memref<1x128xf32, #tpu.memory_space<vmem>>, vector<1x128xf32>
    %11 = vector.broadcast %6 : vector<8x1xf32> to vector<8x128xf32>
    %12 = arith.mulf %9, %11 : vector<8x128xf32>
    %13 = vector.broadcast %10 : vector<1x128xf32> to vector<8x128xf32>
    %14 = arith.addf %13, %12 : vector<8x128xf32>
    %cst_9 = arith.constant 0.000000e+00 : f32
    %15 = vector.broadcast %cst_9 : f32 to vector<8x128xf32>
    %16 = arith.maximumf %14, %15 : vector<8x128xf32>
    %17 = math.sqrt %16 : vector<8x128xf32>
    %cst_10 = arith.constant 0.000000e+00 : f32
    %18 = vector.broadcast %cst_10 : f32 to vector<8x128xf32>
    %19 = arith.subf %18, %17 : vector<8x128xf32>
    %c0_11 = arith.constant 0 : index
    %c0_12 = arith.constant 0 : index
    %20 = vector.load %arg4[%c0_11, %c0_12] : memref<8x128xf32, #tpu.memory_space<vmem>>, vector<8x128xf32>
    tpu.vector_store %arg4[%c0_11, %c0_12], %19 {strides = array<i32>} : memref<8x128xf32, #tpu.memory_space<vmem>>, vector<8x128xf32>,
    return
  }
  func.func @transform_0(%arg0: i32) -> (i32, i32) {
    %c0_i32 = arith.constant 0 : i32
    %c0_i32_0 = arith.constant 0 : i32
    return %arg0, %c0_i32 : i32, i32
  }
  func.func @transform_1(%arg0: i32) -> (i32, i32) {
    %c0_i32 = arith.constant 0 : i32
    %c0_i32_0 = arith.constant 0 : i32
    %c0_i32_1 = arith.constant 0 : i32
    return %c0_i32, %c0_i32_0 : i32, i32
  }
  func.func @transform_2(%arg0: i32) -> (i32, i32) {
    %c0_i32 = arith.constant 0 : i32
    %c0_i32_0 = arith.constant 0 : i32
    %c0_i32_1 = arith.constant 0 : i32
    return %c0_i32, %c0_i32_0 : i32, i32
  }
  func.func @transform_3(%arg0: i32) -> (i32, i32) {
    %c0_i32 = arith.constant 0 : i32
    %c0_i32_0 = arith.constant 0 : i32
    return %arg0, %c0_i32 : i32, i32
  }
}

</mosaic_0001>

<bundles_post_ra>
// kernel: tpu_custom_call.1
= control target key start
LH: loop header
LB: loop body
LE: loop exit
PB: predicated region body
PF: predicated region fallthrough
CT: control target
= control target key end

     0   :  { %8 = vsyncpa [#allocation3], 0  ;;  %s295_s0 = inlined_call_operand.hbm [shape: f32[8,32], index: 0, kind: input, shape index: {}]   ;;  %s296_s1 = inlined_call_operand.hbm [shape: f32[32,128], index: 1, kind: input, shape index: {}]   ;;  %s297_s2 = inlined_call_operand.vmem [shape: f32[1,128], index: 2, kind: input, shape index: {}]   ;;  %s298_s3 = inlined_call_operand.hbm [shape: f32[8,128], index: 3, kind: output, shape index: {}]  }
   0x1   :  { %9 = vsyncpa [#allocation6], 0 }
   0x2   :  { %10 = vsyncpa [#allocation4], 0  ;;  %s256_s12 = smov [#allocation2]   ;;  %s257_s14 = smov [#allocation5]  }
   0x3   :  { %s17_s13 = sshll.u32 %s256_s12, 4  ;;  %s26_s15 = sshll.u32 %s257_s14, 4  ;;  %s18_s13 = int_to_ptr.vmem [resolvable:$true] %s17_s13  ;;  %s27_s15 = int_to_ptr.vmem [resolvable:$true] %s26_s15 }
   0x4   :  { %s198_s16 = scalar_lea.vmem %s18_s13, 128  ;;  %p203_p1 = scmp.lt.s32.totalorder %s18_s13, %s18_s13 }
   0x5   :  { %p199_p0 = scmp.ne.s32.totalorder %s18_s13, %s198_s16  ;;  %p204_p2 = scmp.lt.s32.totalorder %s198_s16, %s198_s16 }
   0x7   :  { %p205_p3 = por %p204_p2, %p203_p1 }
   0x9   :  { %p206_p4 = pnand %p205_p3, %p199_p0 }
   0xb   :  { %209 = shalt.err (!%p206_p4)
}
   0xc   :  { %20 = dma.hbm_to_vmem [thread:$0]  %s295_s0, 128, %s18_s13, [#allocation3]  }
   0xd   :  { %s218_s19 = scalar_lea.vmem %s27_s15, 512  ;;  %p223_p6 = scmp.lt.s32.totalorder %s27_s15, %s27_s15 }
   0xe   :  { %p219_p5 = scmp.ne.s32.totalorder %s27_s15, %s218_s19  ;;  %p224_p7 = scmp.lt.s32.totalorder %s218_s19, %s218_s19 }
  0x10   :  { %p225_p8 = por %p224_p7, %p223_p6 }
  0x12   :  { %p226_p9 = pnand %p225_p8, %p219_p5 }
  0x14   :  { %229 = shalt.err (!%p226_p9)
}
  0x15   :  { %s258_s20 = smov 128   ;;  %s259_s21 = smov 8  }
  0x16   :  { %32 = dma.hbm_to_vmem [thread:$0]  %s296_s1, 512, %s27_s15, [#allocation6], %s258_s20, %s258_s20, %s259_s21  }
  0x17   :  { %250 = dma.done.wait [#allocation3], 128  }
  0x18   :  { %251 = vsyncadd [#allocation3], 4294967168 }
  0x19   :  { %252 = dma.done.wait [#allocation6], 512  }
  0x1a   :  { %253 = vsyncadd [#allocation6], 4294966784  ;;  %v260_v0 = vmov 0.0   ;;  %vm261_vm0 = vmmov 0   ;;  %v52_v1 = vld [vmem:[#allocation5 + $0x18] sm:$0xff]  ;;  %v51_v2 = vld [vmem:[#allocation5 + $0x10] sm:$0xff] }
  0x1b   :  { %168 = vmatprep.subr.mxu0 %v260_v0  ;;  %176 = vmatprep.mubr.msk.f32.mxu0 %vm261_vm0, %v260_v0  ;;  %v41_v3 = vld [vmem:[#allocation2] sm:$0xff]  ;;  %v50_v4 = vld [vmem:[#allocation5 + $0x8] sm:$0xff]  ;;  %vm43_vm1 = vcmask 261120   ;;  %v49_v6 = vld [vmem:[#allocation5] sm:$0xff]  ;;  %s262_s24 = smov [#allocation7]  }
  0x1c   :  { %169 = vmatpush3.msra.mxu0 %v52_v1  ;;  %v42_v5 = vmul.f32 %v41_v3, %v41_v3  ;;  %v162_v12 = vld [vmem:[%s297_s2] ss:$0 sm:$0xff]  ;;  %s151_s25 = sshll.u32 %s262_s24, 4  ;;  %s152_s25 = int_to_ptr.vmem [resolvable:$true] %s151_s25 }
  0x1d   :  { %170 = vmatprep.subr.mxu0 %v260_v0  ;;  %s230_s26 = scalar_lea.vmem %s152_s25, 128  ;;  %p235_p11 = scmp.lt.s32.totalorder %s152_s25, %s152_s25 }
  0x1e   :  { %171 = vmatpush3.msra.mxu0 %v51_v2  ;;  %v44_v7 = vsel %vm43_vm1, %v42_v5, 0.0  ;;  %p231_p10 = scmp.ne.s32.totalorder %s152_s25, %s230_s26  ;;  %p236_p12 = scmp.lt.s32.totalorder %s230_s26, %s230_s26 }
  0x1f   :  { %172 = vmatprep.subr.mxu0 %v260_v0  ;;  %45 = vadd.xlane.f32.xlu0 %v44_v7 }
  0x20   :  { %173 = vmatpush3.msra.mxu0 %v50_v4  ;;  %p237_p13 = por %p236_p12, %p235_p11 }
  0x21   :  { %174 = vmatprep.subr.mxu0 %v260_v0 }
  0x22   :  { %175 = vmatpush3.msra.mxu0 %v49_v6  ;;  %p238_p0 = pnand %p237_p13, %p231_p10 }
  0x23   :  { %177 = vmatmul.mubr.msk.f32.vlgmr.msra.gmra.mxu0 %vm43_vm1, %v41_v3 }
  0xa8   :  { %v46_v8 = vpop.xlane.xlu0 %45 }
  0xa9   :  { %v47_v9 = vmax.f32 %v46_v8, 1e-30 }
  0xab   :  { %186 = vrsqrt.f32 %v47_v9 }
  0xb8   :  { %v187_v10 = vpop.eup %186 }
  0xe3   :  { %v122_v11 = vpop.f32.mrf.mxu0 }
  0xe4   :  { %v127_v13 = vmul.f32 %v187_v10, %v122_v11 }
  0xe5   :  { %v178_v14 = vpop.f32.mrf.mxu0 }
  0xe6   :  { %v134_v15 = vadd.f32 %v162_v12, %v127_v13 }
  0xe8   :  { %v135_v16 = vmax.f32 %v134_v15, 0.0 }
  0xea   :  { %188 = vrsqrt.f32 %v135_v16  ;;  %vm138_vm2 = vcmp.eq.f32.partialorder %v135_v16, inf  ;;  %v141_v19 = vand.u32 2147483648, %v135_v16  ;;  %vm140_vm3 = vcmp.eq.f32.partialorder %v135_v16, 0.0 }
  0xf7   :  { %v189_v17 = vpop.eup %188 }
  0xf8   :  { %v137_v18 = vmul.f32 %v189_v17, %v135_v16 }
  0xfa   :  { %v139_v20 = vsel %vm138_vm2, %v135_v16, %v137_v18 }
  0xfb   :  { %v142_v21 = vsel %vm140_vm3, %v141_v19, %v139_v20 }
  0xfc   :  { %v143_v22 = vsub.f32 0.0, %v142_v21 }
  0xfe   :  { %144 = vst [vmem:[#allocation7] sm:$0xff] %v143_v22 }
  0xff   :  { %241 = shalt.err (!%p238_p0)
}
 0x100   :  { %154 = dma.vmem_to_hbm [thread:$0]  %s152_s25, 128, %s298_s3, [#allocation4]  }
 0x101   :  { %254 = dma.done.wait [#allocation4], 128  }
 0x102   :  { %255 = vsyncadd [#allocation4], 4294967168 }
 0x103   :  { %158 = vsyncpa [#allocation3], 1 }
 0x104   :  { %159 = vsyncpa [#allocation6], 1 }
 0x105   :  { %160 = vsyncpa [#allocation4], 1 }

</bundles_post_ra>
